<compile_context>
chip_gen: v7x
topology: tpu7x:2x2x1
jax: 0.10.0
libtpu: 0.0.40
codegen_flags: <defaults>
</compile_context>

<pallas_src>
import math
from functools import partial

import jax
import jax.numpy as jnp
from jax import lax
from jax.experimental import pallas as pl
from jax.experimental.pallas import tpu as pltpu


def _choose_q_tile(t, b, target):
    """Largest tile (<= target) dividing t; split once more if the grid would
    otherwise collapse to a single step (keeps both v7x TensorCores busy)."""
    tq = t
    for cand in (target, 256, 128, 64, 32, 16, 8):
        if cand <= t and t % cand == 0:
            tq = cand
            break
    if b * (t // tq) < 2 and t % 16 == 0:
        tq = t // 2  # multiple of 8 and divides t
    return tq


# ---------------------------------------------------------------------------
# Fused kernel: projections + causal attention for one query tile.
# ---------------------------------------------------------------------------
def _fused_attn_kernel(x_ref, wq_ref, wk_ref, wv_ref, o_ref, *, tq, dk):
    # x_ref: (T, D) full-sequence activations for this batch element
    # (index_map ignores the query-tile axis -> stays VMEM-resident, no re-DMA).
    qi = pl.program_id(1)
    q_start = qi * tq

    x_all = x_ref[...]                                               # (T, D)
    x_q = x_ref[pl.ds(pl.multiple_of(q_start, tq), tq), :]           # (TQ, D)
    t = x_all.shape[0]

    # Projections fused into the attention step.  Scale folded into Q
    # (TQ x Dk elements) instead of S (TQ x T elements).
    scale = jnp.float32(1.0 / math.sqrt(dk))
    q = jnp.dot(x_q, wq_ref[...], preferred_element_type=jnp.float32) * scale
    k = jnp.dot(x_all, wk_ref[...], preferred_element_type=jnp.float32)
    v = jnp.dot(x_all, wv_ref[...], preferred_element_type=jnp.float32)

    # S = Q @ K^T: contract last axes of both operands -> no materialized k.T.
    s = lax.dot_general(q, k, (((1,), (1,)), ((), ())),
                        preferred_element_type=jnp.float32)          # (TQ, T)

    # Reproduce masked_fill(triu(ones).T, -1e9): mask True where col <= row.
    row = q_start + lax.broadcasted_iota(jnp.int32, (tq, t), 0)
    col = lax.broadcasted_iota(jnp.int32, (tq, t), 1)
    s = jnp.where(col <= row, jnp.float32(-1e9), s)

    # Softmax (f32).  Normalize AFTER the PV matmul so the reciprocal broadcast
    # touches (TQ, Dv) instead of (TQ, T).
    m = jnp.max(s, axis=-1, keepdims=True)
    e = jnp.exp(s - m)
    denom = jnp.sum(e, axis=-1, keepdims=True)                       # (TQ, 1)
    inv = pl.reciprocal(denom, approx=True)                          # EUP slot
    inv = inv * (2.0 - denom * inv)                                  # Newton step -> f32 accuracy

    o = jnp.dot(e, v, preferred_element_type=jnp.float32) * inv      # (TQ, Dv)
    o_ref[...] = o.astype(o_ref.dtype)


# ---------------------------------------------------------------------------
# Wrapper
# ---------------------------------------------------------------------------
@partial(jax.jit, static_argnames=("q_tile_target",))
def single_head_attention(x, wq_t, wk_t, wv_t, q_tile_target=256):
    """x: (B, T, D); w*_t: (D, Dk) / (D, Dv) (already transposed).

    q_tile_target: 256 suits v6e/v7x (256-wide MXU); use 128 on v5e.
    """
    B, T, D = x.shape
    Dk = wq_t.shape[1]
    Dv = wv_t.shape[1]

    TQ = _choose_q_tile(T, B, q_tile_target)
    n_q = T // TQ

    return pl.pallas_call(
        partial(_fused_attn_kernel, tq=TQ, dk=Dk),
        out_shape=jax.ShapeDtypeStruct((B, T, Dv), x.dtype),
        grid_spec=pltpu.PrefetchScalarGridSpec(
            num_scalar_prefetch=0,
            grid=(B, n_q),
            in_specs=[
                # Full-sequence x for this batch element (true width, no padding).
                pl.BlockSpec((pl.Squeezed(), T, D), lambda b, i: (b, 0, 0)),
                pl.BlockSpec((D, Dk), lambda b, i: (0, 0)),
                pl.BlockSpec((D, Dk), lambda b, i: (0, 0)),
                pl.BlockSpec((D, Dv), lambda b, i: (0, 0)),
            ],
            out_specs=pl.BlockSpec((pl.Squeezed(), TQ, Dv),
                                   lambda b, i: (b, i, 0)),
        ),
        compiler_params=pltpu.CompilerParams(
            dimension_semantics=("parallel", "parallel"),
        ),
    )(x, wq_t, wk_t, wv_t)


def _reference(x, wq_t, wk_t, wv_t):
    q = x @ wq_t
    k = x @ wk_t
    v = x @ wv_t
    dk = q.shape[-1]
    s = (q @ jnp.swapaxes(k, -2, -1)) / jnp.sqrt(jnp.float32(dk))
    T = s.shape[-1]
    row = jnp.arange(T)[:, None]
    col = jnp.arange(T)[None, :]
    s = jnp.where(col <= row, -1e9, s)
    p = jax.nn.softmax(s, axis=-1)
    return p @ v


if __name__ == "__main__":
    # Small shapes consistent with the module: batch=2, seq=8, hidden=32.
    B, T, D = 2, 8, 32
    Dk, Dv = D, D  # defaults: output_key_query_dim = output_value_dim = input_dim

    key = jax.random.PRNGKey(0)
    kx, kq, kk, kv = jax.random.split(key, 4)

    x = jax.random.normal(kx, (B, T, D), dtype=jnp.float32)

    # Deterministic init mimicking PyTorch nn.Linear default U(-1/sqrt(in), 1/sqrt(in)).
    bound = 1.0 / math.sqrt(D)
    wq_t = jax.random.uniform(kq, (D, Dk), jnp.float32, -bound, bound)
    wk_t = jax.random.uniform(kk, (D, Dk), jnp.float32, -bound, bound)
    wv_t = jax.random.uniform(kv, (D, Dv), jnp.float32, -bound, bound)

    out = jax.block_until_ready(single_head_attention(x, wq_t, wk_t, wv_t))
    ref = _reference(x, wq_t, wk_t, wv_t)
    assert out.shape == (B, T, Dv)
    assert jnp.allclose(out, ref, atol=1e-3, rtol=1e-3), "mismatch vs reference"

    # Second config exercising the multi-query-tile path (n_q > 1).
    T2 = 16
    x2 = jax.random.normal(jax.random.PRNGKey(1), (B, T2, D), dtype=jnp.float32)
    out2 = jax.block_until_ready(
        single_head_attention(x2, wq_t, wk_t, wv_t, q_tile_target=8))
    ref2 = _reference(x2, wq_t, wk_t, wv_t)
    assert out2.shape == (B, T2, Dv)
    assert jnp.allclose(out2, ref2, atol=1e-3, rtol=1e-3), "mismatch vs reference (tiled)"

    print("KERNEL_OK")
</pallas_src>

<mosaic_0001>
module attributes {stable_mosaic.version = 11 : i64} {
  func.func @_fused_attn_kernel(%arg0: i32, %arg1: i32, %arg2: memref<1x8x32xf32, #tpu.memory_space<vmem>>, %arg3: memref<32x32xf32, #tpu.memory_space<vmem>>, %arg4: memref<32x32xf32, #tpu.memory_space<vmem>>, %arg5: memref<32x32xf32, #tpu.memory_space<vmem>>, %arg6: memref<1x8x32xf32, #tpu.memory_space<vmem>>) attributes {dimension_semantics = [#tpu.dimension_semantics<parallel>, #tpu.dimension_semantics<parallel>], iteration_bounds = array<i64: 2, 1>, scalar_prefetch = 0 : i64, scratch_operands = 0 : i64, tpu.core_type = #tpu.core_type<tc>, window_params = [{transform_indices = @transform_0, window_bounds = array<i64: 1, 8, 32>}, {pipeline_mode = #tpu.pipeline_mode<synchronous>, transform_indices = @transform_1, window_bounds = array<i64: 32, 32>}, {pipeline_mode = #tpu.pipeline_mode<synchronous>, transform_indices = @transform_2, window_bounds = array<i64: 32, 32>}, {pipeline_mode = #tpu.pipeline_mode<synchronous>, transform_indices = @transform_3, window_bounds = array<i64: 32, 32>}, {transform_indices = @transform_4, window_bounds = array<i64: 1, 8, 32>}]} {
    %c8_i32 = arith.constant 8 : i32
    %0 = arith.muli %arg1, %c8_i32 : i32
    %c0 = arith.constant 0 : index
    %c0_0 = arith.constant 0 : index
    %c0_1 = arith.constant 0 : index
    %1 = vector.load %arg2[%c0, %c0_0, %c0_1] : memref<1x8x32xf32, #tpu.memory_space<vmem>>, vector<1x8x32xf32>
    %2 = vector.shape_cast %1 : vector<1x8x32xf32> to vector<8x32xf32>
    %3 = tpu.assume_multiple %0, 8 : i32
    %c0_2 = arith.constant 0 : index
    %4 = arith.index_cast %3 : i32 to index
    %c0_3 = arith.constant 0 : index
    %5 = vector.load %arg2[%c0_2, %4, %c0_3] : memref<1x8x32xf32, #tpu.memory_space<vmem>>, vector<1x8x32xf32>
    %6 = vector.shape_cast %5 : vector<1x8x32xf32> to vector<8x32xf32>
    %c0_4 = arith.constant 0 : index
    %c0_5 = arith.constant 0 : index
    %7 = vector.load %arg3[%c0_4, %c0_5] : memref<32x32xf32, #tpu.memory_space<vmem>>, vector<32x32xf32>
    %cst = arith.constant dense<0.000000e+00> : vector<8x32xf32>
    %8 = tpu.matmul %6, %7, %cst {dimension_numbers = #tpu.dot_dimension_numbers<[1], [0], [0], [1], [0, 0, 1, 1], [], []>} : vector<8x32xf32>, vector<32x32xf32>, vector<8x32xf32> -> vector<8x32xf32>
    %cst_6 = arith.constant 0.176776692 : f32
    %9 = vector.broadcast %cst_6 : f32 to vector<8x32xf32>
    %10 = arith.mulf %8, %9 : vector<8x32xf32>
    %c0_7 = arith.constant 0 : index
    %c0_8 = arith.constant 0 : index
    %11 = vector.load %arg4[%c0_7, %c0_8] : memref<32x32xf32, #tpu.memory_space<vmem>>, vector<32x32xf32>
    %cst_9 = arith.constant dense<0.000000e+00> : vector<8x32xf32>
    %12 = tpu.matmul %2, %11, %cst_9 {dimension_numbers = #tpu.dot_dimension_numbers<[1], [0], [0], [1], [0, 0, 1, 1], [], []>} : vector<8x32xf32>, vector<32x32xf32>, vector<8x32xf32> -> vector<8x32xf32>
    %c0_10 = arith.constant 0 : index
    %c0_11 = arith.constant 0 : index
    %13 = vector.load %arg5[%c0_10, %c0_11] : memref<32x32xf32, #tpu.memory_space<vmem>>, vector<32x32xf32>
    %cst_12 = arith.constant dense<0.000000e+00> : vector<8x32xf32>
    %14 = tpu.matmul %2, %13, %cst_12 {dimension_numbers = #tpu.dot_dimension_numbers<[1], [0], [0], [1], [0, 0, 1, 1], [], []>} : vector<8x32xf32>, vector<32x32xf32>, vector<8x32xf32> -> vector<8x32xf32>
    %cst_13 = arith.constant dense<0.000000e+00> : vector<8x8xf32>
    %15 = tpu.matmul %10, %12, %cst_13 {dimension_numbers = #tpu.dot_dimension_numbers<[1], [1], [0], [0], [0, 0, 1, 0], [], []>} : vector<8x32xf32>, vector<8x32xf32>, vector<8x8xf32> -> vector<8x8xf32>
    %16 = tpu.iota {dimensions = array<i32: 0>} : vector<8x8xi32>
    %17 = vector.broadcast %0 : i32 to vector<8x8xi32>
    %18 = arith.addi %17, %16 : vector<8x8xi32>
    %19 = tpu.iota {dimensions = array<i32: 1>} : vector<8x8xi32>
    %20 = arith.cmpi sle, %19, %18 : vector<8x8xi32>
    %cst_14 = arith.constant -1.000000e+09 : f32
    %21 = vector.broadcast %cst_14 : f32 to vector<8x8xf32>
    %22 = arith.select %20, %21, %15 : vector<8x8xi1>, vector<8x8xf32>
    %cst_15 = arith.constant dense<0xFF800000> : vector<8xf32>
    %23 = vector.multi_reduction <maximumf>, %22, %cst_15 [1] : vector<8x8xf32> to vector<8xf32>
    %24 = vector.shape_cast %23 : vector<8xf32> to vector<8x1xf32>
    %25 = vector.broadcast %24 : vector<8x1xf32> to vector<8x8xf32>
    %26 = arith.subf %22, %25 : vector<8x8xf32>
    %27 = math.exp %26 : vector<8x8xf32>
    %cst_16 = arith.constant dense<0.000000e+00> : vector<8xf32>
    %28 = vector.multi_reduction <add>, %27, %cst_16 [1] : vector<8x8xf32> to vector<8xf32>
    %29 = vector.shape_cast %28 : vector<8xf32> to vector<8x1xf32>
    %30 = tpu.reciprocal %29 {approx = true} : vector<8x1xf32> -> vector<8x1xf32>
    %31 = arith.mulf %29, %30 : vector<8x1xf32>
    %cst_17 = arith.constant 2.000000e+00 : f32
    %32 = vector.broadcast %cst_17 : f32 to vector<8x1xf32>
    %33 = arith.subf %32, %31 : vector<8x1xf32>
    %34 = arith.mulf %30, %33 : vector<8x1xf32>
    %cst_18 = arith.constant dense<0.000000e+00> : vector<8x32xf32>
    %35 = tpu.matmul %27, %14, %cst_18 {dimension_numbers = #tpu.dot_dimension_numbers<[1], [0], [0], [1], [0, 0, 1, 1], [], []>} : vector<8x8xf32>, vector<8x32xf32>, vector<8x32xf32> -> vector<8x32xf32>
    %36 = vector.broadcast %34 : vector<8x1xf32> to vector<8x32xf32>
    %37 = arith.mulf %35, %36 : vector<8x32xf32>
    %c0_19 = arith.constant 0 : index
    %c0_20 = arith.constant 0 : index
    %c0_21 = arith.constant 0 : index
    %38 = vector.load %arg6[%c0_19, %c0_20, %c0_21] : memref<1x8x32xf32, #tpu.memory_space<vmem>>, vector<1x8x32xf32>
    %39 = vector.shape_cast %38 : vector<1x8x32xf32> to vector<8x32xf32>
    %40 = vector.shape_cast %37 : vector<8x32xf32> to vector<1x8x32xf32>
    tpu.vector_store %arg6[%c0_19, %c0_20, %c0_21], %40 {strides = array<i32>} : memref<1x8x32xf32, #tpu.memory_space<vmem>>, vector<1x8x32xf32>,
    return
  }
  func.func @transform_0(%arg0: i32, %arg1: i32) -> (i32, i32, i32) {
    %c0_i32 = arith.constant 0 : i32
    %c0_i32_0 = arith.constant 0 : i32
    %c0_i32_1 = arith.constant 0 : i32
    return %arg0, %c0_i32, %c0_i32_0 : i32, i32, i32
  }
  func.func @transform_1(%arg0: i32, %arg1: i32) -> (i32, i32) {
    %c0_i32 = arith.constant 0 : i32
    %c0_i32_0 = arith.constant 0 : i32
    %c0_i32_1 = arith.constant 0 : i32
    return %c0_i32, %c0_i32_0 : i32, i32
  }
  func.func @transform_2(%arg0: i32, %arg1: i32) -> (i32, i32) {
    %c0_i32 = arith.constant 0 : i32
    %c0_i32_0 = arith.constant 0 : i32
    %c0_i32_1 = arith.constant 0 : i32
    return %c0_i32, %c0_i32_0 : i32, i32
  }
  func.func @transform_3(%arg0: i32, %arg1: i32) -> (i32, i32) {
    %c0_i32 = arith.constant 0 : i32
    %c0_i32_0 = arith.constant 0 : i32
    %c0_i32_1 = arith.constant 0 : i32
    return %c0_i32, %c0_i32_0 : i32, i32
  }
  func.func @transform_4(%arg0: i32, %arg1: i32) -> (i32, i32, i32) {
    %c0_i32 = arith.constant 0 : i32
    %c0_i32_0 = arith.constant 0 : i32
    return %arg0, %arg1, %c0_i32 : i32, i32, i32
  }
}

</mosaic_0001>

<bundles_post_ra>
// kernel: single_head_attention.1
= control target key start
LH: loop header
LB: loop body
LE: loop exit
PB: predicated region body
PF: predicated region fallthrough
CT: control target
= control target key end

     0   :  { %9 = vsyncpa [#allocation3], 0  ;;  %s1553_s0 = inlined_call_operand.hbm [shape: f32[2,8,32], index: 0, kind: input, shape index: {}]   ;;  %s1554_s1 = inlined_call_operand.hbm [shape: f32[32,32], index: 1, kind: input, shape index: {}]   ;;  %s1555_s2 = inlined_call_operand.hbm [shape: f32[32,32], index: 2, kind: input, shape index: {}]   ;;  %s1556_s3 = inlined_call_operand.hbm [shape: f32[32,32], index: 3, kind: input, shape index: {}]   ;;  %s1557_s4 = inlined_call_operand.hbm [shape: f32[2,8,32], index: 4, kind: output, shape index: {}]  }
   0x1   :  { %11 = vsyncpa [#allocation3 + $0x1], 0 }
   0x2   :  { %12 = vsyncpa [#allocation6], 0 }
   0x3   :  { %13 = vsyncpa [#allocation9], 0 }
   0x4   :  { %14 = vsyncpa [#allocation4], 0 }
   0x5   :  { %16 = vsyncpa [#allocation4 + $0x1], 0  ;;  %s1251_s15 = smov 0   ;;  %s1253_s16 = smov 0  }
   0x6   :  { %s1255_s17 = smov 0   ;;  %s1257_s18 = smov 0  }
   0x7   :  { %s1259_s19 = smov 0   ;;  %s1261_s20 = smov 0  }
   0x8 LB: > { %s803_s21 = sadd.s32 4294967295, %s1214_s20   ;;  %s804_s22 = sadd.s32 4294967294, %s1214_s20   ;;  %s1214_s20 = sphi %s1261_s20, %s22_s20   ;;  %s1210_s19 = sphi %s1259_s19, %s1584_s19   ;;  %s1206_s18 = sphi %s1257_s18, %s1583_s18   ;;  %s1202_s17 = sphi %s1255_s17, %s1582_s17   ;;  %s1198_s16 = sphi %s1253_s16, %s1581_s16   ;;  %s1194_s15 = sphi %s1251_s15, %s1580_s15  }
   0x9   : > { %p54_p0 = scmp.ne.s32.totalorder %s1198_s16, %s1194_s15  ;;  %p1285_p1 = scmp.eq.s32.totalorder %s803_s21, 0 }
   0xa   : > { %p1289_p2 = scmp.eq.s32.totalorder %s803_s21, 1  ;;  %p149_p3 = scmp.eq.s32.totalorder %s804_s22, 1 }
   0xb   : > { %s1563_s23 = scalar_select %p1285_p1, 1, 0 }
   0xc   : > { %s1564_s24 = scalar_select %p1289_p2, 1, 0 }
   0xd   : > { %p1295_p4 = por %p1285_p1, %p54_p0  ;;  %p805_p5 = scmp.ge.s32.totalorder %s1214_s20, 1 }
   0xe   : > { %p1300_p6 = por %p149_p3, %p54_p0  ;;  %p156_p7 = scmp.lt.s32.totalorder %s1214_s20, 3 }
   0xf   : > { %s1565_s25 = scalar_select %p1295_p4, 1, 0 }
  0x10   : > { %s1566_s26 = scalar_select %p1300_p6, 1, 0 }
  0x11   : > { %p1305_p8 = pnand %p805_p5, %p156_p7  ;;  %s1216_s28 = smov [#allocation5]  }
  0x12   : > { %1567 = sst [smem:[#allocation15_spill]] %s1566_s26  ;;  %s168_s29 = sshll.u32 %s1216_s28, 4  ;;  %s1309_s29 = int_to_ptr.vmem [resolvable:$true] %s168_s29 }
  0x13   : > { %s1568_s27 = scalar_select %p1305_p8, 1, 0 }
  0x14   : > { %p924_p9 = pneg %p1305_p8  ;;  %s1217_s5 = smov [#allocation7]  }
  0x15   : > { %s181_s6 = sshll.u32 %s1217_s5, 4  ;;  %s1218_s7 = smov [#allocation8]   ;;  %s1320_s6 = int_to_ptr.vmem [resolvable:$true] %s181_s6 }
  0x16   : > { %p1316_p11 = pnand %p924_p9, %p1285_p1  ;;  %s1322_s8 = sshll.u32 %s1218_s7, 4  ;;  %s195_s8 = int_to_ptr.vmem [resolvable:$true] %s1322_s8 }
  0x17   : > { %s1010_s11 = scalar_lea.hbm %s1554_s1, 512 }
  0x18   : > { %p1011_p12 = scmp.ne.s32.totalorder %s1554_s1, %s1010_s11  ;;  %p1332_p13 = pneg %p1316_p11 }
  0x19   : > { %p1017_p5 = scmp.lt.u32.totalorder %s1010_s11, %s1554_s1 }
  0x1a   : > { %p1013_p0 = pnand %p1332_p13, %p1011_p12 }
  0x1c   : > { %p1014_p3 = pneg %p1013_p0 }
  0x1e   : > { %p1019_p7 = pnand %p1017_p5, %p1014_p3 }
  0x20   : > { %1022 = shalt.err (!%p1019_p7)
}
  0x21   : > { %s1023_s28 = scalar_lea.vmem %s1309_s29, 512  ;;  %p1031_p1 = scmp.lt.s32.totalorder %s1309_s29, %s1309_s29 }
  0x22   : > { %p1024_p9 = scmp.ne.s32.totalorder %s1309_s29, %s1023_s28  ;;  %p1032_p4 = scmp.lt.s32.totalorder %s1023_s28, %s1023_s28 }
  0x24   : > { %p1026_p10 = pnand %p1024_p9, %p1332_p13  ;;  %p1033_p12 = por %p1032_p4, %p1031_p1 }
  0x26   : > { %p1027_p6 = pneg %p1026_p10 }
  0x28   : > { %p1034_p0 = pnand %p1033_p12, %p1027_p6 }
  0x2a   : > { %1037 = shalt.err (!%p1034_p0)
}
  0x2b   : > { %s1219_s5 = smov 128   ;;  %s1220_s7 = smov 8  }
  0x2c   : > { %927 = dma.hbm_to_vmem [thread:$0]  (!%p1316_p11), %s1554_s1, 512, %s1309_s29, [#allocation6], %s1219_s5, %s1219_s5, %s1220_s7  }
  0x2d   : > { %s1038_s13 = scalar_lea.hbm %s1555_s2, 512 }
  0x2e   : > { %p1039_p1 = scmp.ne.s32.totalorder %s1555_s2, %s1038_s13  ;;  %p1045_p10 = scmp.lt.u32.totalorder %s1038_s13, %s1555_s2 }
  0x30   : > { %p1041_p4 = pnand %p1039_p1, %p1332_p13 }
  0x32   : > { %p1042_p6 = pneg %p1041_p4 }
  0x34   : > { %p1047_p3 = pnand %p1045_p10, %p1042_p6 }
  0x36   : > { %1050 = shalt.err (!%p1047_p3)
}
  0x37   : > { %s1051_s29 = scalar_lea.vmem %s1320_s6, 512  ;;  %p1059_p12 = scmp.lt.s32.totalorder %s1320_s6, %s1320_s6 }
  0x38   : > { %p1052_p5 = scmp.ne.s32.totalorder %s1320_s6, %s1051_s29  ;;  %p1060_p0 = scmp.lt.s32.totalorder %s1051_s29, %s1051_s29 }
  0x3a   : > { %p1054_p7 = pnand %p1052_p5, %p1332_p13  ;;  %p1061_p1 = por %p1060_p0, %p1059_p12 }
  0x3c   : > { %p1055_p9 = pneg %p1054_p7 }
  0x3e   : > { %p1062_p4 = pnand %p1061_p1, %p1055_p9 }
  0x40   : > { %1065 = shalt.err (!%p1062_p4)
}
  0x41   : > { %930 = dma.hbm_to_vmem [thread:$0]  (!%p1316_p11), %s1555_s2, 512, %s1320_s6, [#allocation6], %s1219_s5, %s1219_s5, %s1220_s7  }
  0x42   : > { %s1066_s12 = scalar_lea.hbm %s1556_s3, 512 }
  0x43   : > { %p1067_p6 = scmp.ne.s32.totalorder %s1556_s3, %s1066_s12  ;;  %p1073_p5 = scmp.lt.u32.totalorder %s1066_s12, %s1556_s3 }
  0x45   : > { %p1069_p10 = pnand %p1067_p6, %p1332_p13 }
  0x47   : > { %p1070_p3 = pneg %p1069_p10 }
  0x49   : > { %p1075_p7 = pnand %p1073_p5, %p1070_p3 }
  0x4b   : > { %1078 = shalt.err (!%p1075_p7)
}
  0x4c   : > { %s1079_s29 = scalar_lea.vmem %s195_s8, 512  ;;  %p1087_p1 = scmp.lt.s32.totalorder %s195_s8, %s195_s8 }
  0x4d   : > { %p1080_p9 = scmp.ne.s32.totalorder %s195_s8, %s1079_s29  ;;  %p1088_p4 = scmp.lt.s32.totalorder %s1079_s29, %s1079_s29 }
  0x4f   : > { %p1082_p12 = pnand %p1080_p9, %p1332_p13  ;;  %p1089_p8 = por %p1088_p4, %p1087_p1 }
  0x51   : > { %p1083_p0 = pneg %p1082_p12 }
  0x53   : > { %p1090_p2 = pnand %p1089_p8, %p1083_p0 }
  0x55   : > { %1093 = shalt.err (!%p1090_p2)
}
  0x56   : > { %933 = dma.hbm_to_vmem [thread:$0]  (!%p1316_p11), %s1556_s3, 512, %s195_s8, [#allocation9], %s1219_s5, %s1219_s5, %s1220_s7  }
  0x57   : > { %s41_s14 = sadd.s32 1, %s1202_s17  ;;  %s34_s30 = sadd.s32 1, %s1210_s19 }
  0x58   : > { %p48_p2 = scmp.ne.s32.totalorder %s1202_s17, %s1198_s16  ;;  %p36_p8 = scmp.ge.s32.totalorder %s34_s30, 2 }
  0x59   : > { %p49_p13 = scmp.eq.s32.totalorder %s1214_s20, 0  ;;  %p1571_p6 = scmp.ne.s32.totalorder %s1564_s24, 0 }
  0x5a   : > { %p945_p3 = scmp.lt.s32.totalorder %s1214_s20, 2  ;;  %s1586_s30 = smov (%p36_p8, %s34_s30), 0 }
  0x5b   : > { %p1411_p10 = por %p1571_p6, %p48_p2  ;;  %p50_p5 = por %p49_p13, %p48_p2 }
  0x5c   : > { %s208_s10 = sand.u32 1, %s1202_s17   ;;  %s38_s11 = ssub.s32 %s1210_s19, %s1586_s30 }
  0x5d   : > { %p39_p7 = scmp.eq.s32.totalorder %s38_s11, 0  ;;  %s810_s8 = sshll.u32 %s208_s10, 3 }
  0x5e   : > { %s811_s5 = sshll.u32 %s1210_s19, 7  ;;  %s212_s21 = scalar_lea.vmem [#allocation2], %s810_s8 }
  0x5f   : > { %s1423_s7 = scalar_select %p39_p7, %s1202_s17, %s41_s14  }
  0x60   : > { %s1428_s24 = scalar_lea.hbm %s1553_s0, %s811_s5  ;;  %s219_s22 = sshll.u32 %s212_s21, 4  ;;  %s1430_s22 = int_to_ptr.vmem [resolvable:$true] %s219_s22 }
  0x61   : > { %p1434_p11 = pnand %p945_p3, %p50_p5  ;;  %s209_s29 = scalar_lea.sflag [#allocation3], %s208_s10 }
  0x62   : > { %s1094_s6 = scalar_lea.hbm %s1428_s24, 128  ;;  %s1099_s11 = scalar_lea.hbm %s1553_s0, 256 }
  0x63   : > { %p1095_p9 = scmp.ne.s32.totalorder %s1428_s24, %s1094_s6  ;;  %p1096_p12 = pneg %p1434_p11 }
  0x64   : > { %p1100_p4 = scmp.lt.u32.totalorder %s1428_s24, %s1553_s0  ;;  %p1101_p2 = scmp.lt.u32.totalorder %s1099_s11, %s1094_s6 }
  0x65   : > { %p1097_p0 = pnand %p1096_p12, %p1095_p9  ;;  %p1103_p13 = scmp.lt.u32.totalorder %s1094_s6, %s1428_s24 }
  0x66   : > { %p1102_p8 = por %p1101_p2, %p1100_p4 }
  0x67   : > { %p1098_p1 = pneg %p1097_p0 }
  0x68   : > { %p1104_p6 = por %p1103_p13, %p1102_p8 }
  0x6a   : > { %p1105_p3 = pnand %p1104_p6, %p1098_p1 }
  0x6c   : > { %1108 = shalt.err (!%p1105_p3)
}
  0x6d   : > { %s1109_s10 = scalar_lea.vmem %s1430_s22, 128  ;;  %s1221_s12 = smov [#allocation2]  }
  0x6e   : > { %p1110_p5 = scmp.ne.s32.totalorder %s1430_s22, %s1109_s10  ;;  %s1114_s13 = sshll.u32 %s1221_s12, 4  ;;  %s1115_s13 = int_to_ptr.vmem [resolvable:$false] %s1114_s13 }
  0x6f   : > { %s1116_s21 = scalar_lea.vmem %s1115_s13, 256  ;;  %p1117_p0 = scmp.lt.s32.totalorder %s1430_s22, %s1115_s13 }
  0x70   : > { %p1112_p7 = pnand %p1110_p5, %p1096_p12  ;;  %p1118_p4 = scmp.lt.s32.totalorder %s1116_s21, %s1109_s10 }
  0x72   : > { %p1113_p9 = pneg %p1112_p7  ;;  %p1119_p2 = por %p1118_p4, %p1117_p0 }
  0x74   : > { %p1120_p8 = pnand %p1119_p2, %p1113_p9 }
  0x76   : > { %1123 = shalt.err (!%p1120_p8)
}
  0x77   : > { %937 = dma.hbm_to_vmem [thread:$0]  (!%p1434_p11), %s1428_s24, 128, %s1430_s22, %s209_s29  }
  0x78   : > { %p1574_p1 = scmp.ne.s32.totalorder %s1568_s27, 0 }
  0x79   : > { %s1466_s6 = sand.u32 (!%p1574_p1), 1, %s1198_s16   ;;  %p1575_p12 = scmp.ne.s32.totalorder (!%p1574_p1), %s1565_s25, 0 }
  0x7a   : > { %228 = sbr.rel (%p1574_p1) target bundleno = 960 (0x3c0), region = 36  ;;  %s813_s26 = sshll.u32 (!%p1574_p1), %s1466_s6, 3 }
  0x7b   : > { %s231_s14 = scalar_lea.sflag (!%p1574_p1), [#allocation3], %s1466_s6  ;;  %s1472_s11 = scalar_lea.vmem (!%p1574_p1), [#allocation2], %s813_s26 }
  0x81   : > { %1177 = dma.done.wait (%p1575_p12), %s231_s14, 128  }
  0x82   : > { %1179 = vsyncadd (%p1575_p12), %s231_s14, 4294967168  ;;  %p1576_p11 = scmp.ne.s32.totalorder %s1563_s23, 0 }
  0x84   : > { %1181 = dma.done.wait (%p1576_p11), [#allocation6], 1024  }
  0x85   : > { %1183 = vsyncadd (%p1576_p11), [#allocation6], 4294966272 }
  0x86   : > { %1185 = dma.done.wait (%p1576_p11), [#allocation9], 512  }
  0x87   : > { %1187 = vsyncadd (%p1576_p11), [#allocation9], 4294966784  ;;  %v1222_v0 = vmov 0.0|0.0   ;;  %vm1223_vm0 = vmmov 0   ;;  %v1224_v1 = vmov 0.0   ;;  %v354_v2 = vld [vmem:[#allocation7] sm:$0xff]  ;;  %v581_v26 = vlaneseq }
  0x88   : > { %896 = vmatprep.subr.bf16.mxu1 %v1222_v0  ;;  %890 = vmatprep.subr.bf16.mxu0 %v1222_v0  ;;  %v355_v3 = vld [vmem:[#allocation7 + $0x8] sm:$0xff]  ;;  %v275_v4 = vld [vmem:[#allocation5] sm:$0xff]  ;;  %v356_v7 = vld [vmem:[#allocation7 + $0x10] sm:$0xff]  ;;  %vm279_vm1 = vcmask 261120   ;;  %vm589_vm3 = vcmask 64512   ;;  %s825_s23 = sshll.u32 %s1206_s18, 7 }
  0x89   : > { %866 = vmatprep.mubr.msk.f32.mxu1 %vm1223_vm0, %v1224_v1  ;;  %855 = vmatprep.mubr.msk.f32.mxu0 %vm1223_vm0, %v1224_v1  ;;  %v897_v5 = vpack.c.bf16 %v355_v3, %v354_v2  ;;  %v276_v6 = vld [vmem:[#allocation5 + $0x8] sm:$0xff]  ;;  %v357_v8 = vld [vmem:[#allocation7 + $0x18] sm:$0xff]  ;;  %v277_v10 = vld [vmem:[#allocation5 + $0x10] sm:$0xff]  ;;  %v582_v27 = vshrl.u32 %v581_v26, 7  ;;  %v586_v28 = vand.u32 127, %v581_v26  ;;  %s270_s25 = scalar_lea.vmem [#allocation10], %s813_s26  ;;  %s1503_s28 = scalar_lea.hbm %s1557_s4, %s825_s23 }
  0x8a   : > { %v891_v9 = vpack.c.bf16 %v276_v6, %v275_v4  ;;  %v278_v11 = vld [vmem:[#allocation5 + $0x18] sm:$0xff]  ;;  %v900_v12 = vpack.c.bf16 %v357_v8, %v356_v7  ;;  %v431_v15 = vld [vmem:[#allocation8] sm:$0xff]  ;;  %v432_v16 = vld [vmem:[#allocation8 + $0x8] sm:$0xff]  ;;  %s693_s27 = sshll.u32 %s270_s25, 4  ;;  %s679_s18 = scalar_lea.sflag [#allocation4], %s1466_s6  ;;  %s1505_s27 = int_to_ptr.vmem [resolvable:$true] %s693_s27 }
  0x8b   : > { %898 = vmatpush3.bf16.msra.mxu1 %v897_v5  ;;  %v894_v13 = vpack.c.bf16 %v278_v11, %v277_v10  ;;  %v272_v14 = vld [vmem:[%s1472_s11] sm:$0xff]  ;;  %v903_v18 = vpack.c.bf16 %v432_v16, %v431_v15  ;;  %vm587_vm2 = vcmp.le.s32.totalorder %v586_v28, %v582_v27  ;;  %s1124_s29 = scalar_lea.vmem %s1505_s27, 128  ;;  %s1225_s8 = smov [#allocation10]  }
  0x8c   : > { %892 = vmatpush3.bf16.msra.mxu0 %v891_v9  ;;  %899 = vmatprep.subr.bf16.mxu1 %v1222_v0  ;;  %v433_v17 = vld [vmem:[#allocation8 + $0x10] sm:$0xff]  ;;  %v434_v19 = vld [vmem:[#allocation8 + $0x18] sm:$0xff]  ;;  %p1125_p13 = scmp.ne.s32.totalorder %s1505_s27, %s1124_s29  ;;  %s1128_s5 = sshll.u32 %s1225_s8, 4  ;;  %s1129_s5 = int_to_ptr.vmem [resolvable:$false] %s1128_s5 }
  0x8d   : > { %893 = vmatprep.subr.bf16.mxu0 %v1222_v0  ;;  %v906_v20 = vpack.c.bf16 %v434_v19, %v433_v17  ;;  %s1130_s10 = scalar_lea.vmem %s1129_s5, 256  ;;  %p1131_p5 = scmp.lt.s32.totalorder %s1505_s27, %s1129_s5 }
  0x8e   : > { %p1126_p6 = pnand %p1125_p13, %p1411_p10  ;;  %p1132_p7 = scmp.lt.s32.totalorder %s1130_s10, %s1124_s29 }
  0x8f   : > { %901 = vmatpush3.bf16.msra.mxu1 %v900_v12 }
  0x90   : > { %895 = vmatpush3.bf16.msra.mxu0 %v894_v13  ;;  %880 = vmatprep.subr.mxu1 %v1224_v1  ;;  %p1127_p3 = pneg %p1126_p6  ;;  %p1133_p9 = por %p1132_p7, %p1131_p5 }
  0x91   : > { %902 = vmatprep.subr.bf16.mxu0 %v1222_v0 }
  0x92   : > { %867 = vmatmul.mubr.msk.f32.vlgmr.msra.gmra.mrb[0].mxu1 %vm279_vm1, %v272_v14  ;;  %p1134_p0 = pnand %p1133_p9, %p1127_p3 }
  0x93   : > { %856 = vmatmul.mubr.msk.f32.vlgmr.msra.gmra.mrb[0].mxu0 %vm279_vm1, %v272_v14  ;;  %882 = vmatprep.mubr.msk.f32.mxu1 %vm1223_vm0, %v1224_v1 }
  0x94   : > { %877 = vmatprep.mubr.msk.f32.mxu0 %vm1223_vm0, %v1224_v1  ;;  %904 = vmatpush3.bf16.msra.mxu0 %v903_v18 }
  0x95   : > { %905 = vmatprep.subr.bf16.mxu0 %v1222_v0 }
  0x98   : > { %907 = vmatpush3.bf16.msra.mxu0 %v906_v20 }
  0x9b   : > { %878 = vmatmul.mubr.msk.f32.vlgmr.msra.gmra.mrb[2].mxu0 %vm279_vm1, %v272_v14 }
 0x165   : > { %v427_v21 = vpop.f32.mrb[0].mxu1 }
 0x166   : > { %v349_v22 = vpop.f32.mrb[0].mxu0  ;;  %v868_v23 = vpop.f32.mrb[1].mxu1  ;;  %881 = vmatpush3.xpose.msk.msra.mxu1 %vm279_vm1, %v427_v21 }
 0x167   : > { %v353_v24 = vmul.f32 0.17677669, %v349_v22  ;;  %v857_v25 = vpop.f32.mrb[1].mxu0  ;;  %885 = vmatprep.subr.mxu1 %v1224_v1 }
 0x169   : > { %883 = vmatmul.mubr.msk.f32.vlgmr.msra.gmra.mrb[2].mxu1 %vm279_vm1, %v353_v24 }
 0x16a   : > { %887 = vmatprep.mubr.msk.f32.mxu1 %vm1223_vm0, %v1224_v1 }
 0x16e   : > { %v501_v33 = vpop.f32.mrb[2].mxu0 }
 0x16f   : > { %v879_v34 = vpop.f32.mrb[3].mxu0  ;;  %886 = vmatpush3.msra.mxu1 %v501_v33 }
 0x23c   : > { %v577_v29 = vpop.f32.mrb[2].mxu1 }
 0x23d   : > { %v588_v30 = vsel %vm587_vm2, -1e+09, %v577_v29  ;;  %v884_v31 = vpop.f32.mrb[3].mxu1 }
 0x23e   : > { %v590_v32 = vsel %vm589_vm3, %v588_v30, -inf }
 0x23f   : > { %591 = vmax.xlane.f32.xlu0 %v590_v32 }
 0x2cc   : > { %v592_v35 = vpop.xlane.xlu0 %591 }
 0x2cd   : > { %v593_v36 = vsub.f32 %v588_v30, %v592_v35 }
 0x2cf   : > { %v594_v37 = vmul.f32 1.442695, %v593_v36 }
 0x2d1   : > { %1006 = vpow2.f32 %v594_v37 }
 0x2db   : > { %v1007_v38 = vpop.eup %1006 }
 0x2dc   : > { %888 = vmatmul.mubr.msk.f32.vlgmr.msra.gmra.mrb[4].mxu1 %vm589_vm3, %v1007_v38  ;;  %v596_v39 = vsel %vm589_vm3, %v1007_v38, 0.0 }
 0x2dd   : > { %597 = vadd.xlane.f32.xlu0 %v596_v39 }
 0x36a   : > { %v598_v40 = vpop.xlane.xlu0 %597 }
 0x36b   : > { %1008 = vrcp.f32 %v598_v40 }
 0x375   : > { %v1009_v41 = vpop.eup %1008 }
 0x376   : > { %v600_v42 = vmul.f32 %v1009_v41, %v598_v40 }
 0x378   : > { %v601_v43 = vsub.f32 2.0, %v600_v42 }
 0x37a   : > { %v602_v44 = vmul.f32 %v1009_v41, %v601_v43 }
 0x3af   : > { %v672_v45 = vpop.f32.mrb[4].mxu1 }
 0x3b0   : > { %v676_v46 = vmul.f32 %v672_v45, %v602_v44  ;;  %v889_v47 = vpop.f32.mrb[5].mxu1 }
 0x3b2   : > { %677 = vst.msk [vmem:[%s270_s25] sm:$0xff] %vm279_vm1, %v676_v46 }
 0x3b3   : > { %1137 = shalt.err (!%p1134_p0)
}
 0x3b4   : > { %s1138_s12 = scalar_lea.hbm %s1503_s28, 128  ;;  %s1142_s6 = scalar_lea.hbm %s1557_s4, 256 }
 0x3b5   : > { %p1139_p4 = scmp.ne.s32.totalorder %s1503_s28, %s1138_s12  ;;  %p1143_p1 = scmp.lt.u32.totalorder %s1503_s28, %s1557_s4 }
 0x3b6   : > { %p1144_p12 = scmp.lt.u32.totalorder %s1142_s6, %s1138_s12  ;;  %p1146_p13 = scmp.lt.u32.totalorder %s1138_s12, %s1503_s28 }
 0x3b7   : > { %p1140_p2 = pnand %p1139_p4, %p1411_p10 }
 0x3b8   : > { %p1145_p11 = por %p1144_p12, %p1143_p1 }
 0x3b9   : > { %p1141_p8 = pneg %p1140_p2 }
 0x3ba   : > { %p1147_p6 = por %p1146_p13, %p1145_p11 }
 0x3bc   : > { %p1148_p3 = pnand %p1147_p6, %p1141_p8 }
 0x3be   : > { %1151 = shalt.err (!%p1148_p3)
}
 0x3bf   : > { %922 = dma.vmem_to_hbm [thread:$0]  (%p1411_p10), %s1505_s27, 128, %s1503_s28, %s679_s18  }
 0x3c0 PF: > { %s1577_s11 = sld [smem:[#allocation15_spill]]  ;;  %s705_s23 = sand.u32 1, %s1194_s15  }
 0x3c1   : > { %p1579_p7 = scmp.ge.s32.totalorder %s1214_s20, 2  ;;  %s706_s25 = scalar_lea.sflag [#allocation4], %s705_s23 }
 0x3c6   : > { %p1578_p5 = scmp.ne.s32.totalorder %s1577_s11, 0 }
 0x3c8   : > { %p939_p9 = pnand %p1579_p7, %p1578_p5 }
 0x3ca   : > { %1189 = dma.done.wait (!%p939_p9), %s706_s25, 128  }
 0x3cb   : > { %1191 = vsyncadd (!%p939_p9), %s706_s25, 4294967168  ;;  %s22_s20 = sadd.s32 1, %s1214_s20   ;;  %s1580_s15 = smov %s1198_s16 }
 0x3cc   : > { %p19_p0 = scmp.ge.s32.totalorder %s22_s20, 4   ;;  %s1581_s16 = smov %s1202_s17 }
 0x3cd   : > { %s1582_s17 = smov %s1423_s7  ;;  %s1583_s18 = smov %s1210_s19 }
 0x3ce   : > { %s1584_s19 = smov %s1586_s30  ;;  %21 = sbr.rel (!%p19_p0) target bundleno = 8 (0x8), region = 94 }
 0x3d5   :  { %711 = vsyncpa [#allocation3], 1 }
 0x3d6   :  { %713 = vsyncpa [#allocation3 + $0x1], 1 }
 0x3d7   :  { %714 = vsyncpa [#allocation6], 1 }
 0x3d8   :  { %715 = vsyncpa [#allocation9], 1 }
 0x3d9   :  { %716 = vsyncpa [#allocation4], 1 }
 0x3da   :  { %718 = vsyncpa [#allocation4 + $0x1], 1 }

</bundles_post_ra>
